<compile_context>
chip_gen: v5e
topology: v5e:2x2
jax: 0.10.0
libtpu: 0.0.40
codegen_flags: <defaults>
</compile_context>

<pallas_src>
import functools

import jax
import jax.numpy as jnp
from jax.experimental import pallas as pl
from jax.experimental.pallas import tpu as pltpu

_NEG = -1e30  # finite "minus infinity" bias on padded action lanes (f32-representable)


def _round_up(x, m):
    return ((x + m - 1) // m) * m


def _pg_pi_kernel(x_ref, w1_ref, b1_ref, w2_ref, b2_ref, out_ref, *, n_actions):
    # Layer 1: MXU matmul (bf16 operands, f32 accumulation) + f32 bias + ReLU.
    x = x_ref[...].astype(w1_ref.dtype)                              # (tb, K) bf16
    h = jnp.dot(x, w1_ref[...], preferred_element_type=jnp.float32)  # (tb, H_pad) f32
    h = jnp.maximum(h + b1_ref[...], 0.0)
    # Layer 2: padded action lanes carry a -1e30 bias -> exp() underflows to 0,
    # so the 128-lane softmax denominator needs no explicit masking.
    logits = jnp.dot(h.astype(w2_ref.dtype), w2_ref[...],
                     preferred_element_type=jnp.float32) + b2_ref[...]
    m = jnp.max(logits, axis=-1, keepdims=True)
    e = jnp.exp(logits - m)
    p = e * pl.reciprocal(jnp.sum(e, axis=-1, keepdims=True), approx=True)
    # Narrow store: only real action lanes go back to HBM (16 B/row vs 512 B/row).
    out_ref[...] = p[:, :n_actions]


def pack_pg_params(w1, b1, w2, b2, compute_dtype=jnp.bfloat16):
    """One-time weight/bias packing; call once, reuse every policy step.

    w1: (state_dim, hidden_dim)  b1: (hidden_dim,)
    w2: (hidden_dim, n_actions)  b2: (n_actions,)
    Only the hidden / action axes are padded to 128 lanes; K stays at state_dim.
    Biases stay f32; padded action lanes get a -1e30 bias (-> softmax prob 0).
    """
    state_dim, hidden_dim = w1.shape
    n_actions = w2.shape[1]
    h_pad = _round_up(hidden_dim, 128)
    a_pad = _round_up(n_actions, 128)

    w1_p = (jnp.zeros((state_dim, h_pad), jnp.float32)
            .at[:, :hidden_dim].set(w1.astype(jnp.float32))
            .astype(compute_dtype))
    b1_p = (jnp.zeros((1, h_pad), jnp.float32)
            .at[0, :hidden_dim].set(b1.astype(jnp.float32)))
    w2_p = (jnp.zeros((h_pad, a_pad), jnp.float32)
            .at[:hidden_dim, :n_actions].set(w2.astype(jnp.float32))
            .astype(compute_dtype))
    b2_p = (jnp.full((1, a_pad), _NEG, jnp.float32)
            .at[0, :n_actions].set(b2.astype(jnp.float32)))
    return w1_p, b1_p, w2_p, b2_p


def _choose_tiles(batch, max_tile):
    """Batch tile (multiple of 16 for bf16 sublane packing) and padded batch."""
    b16 = _round_up(max(batch, 1), 16)
    if b16 <= max_tile:
        return b16, b16                       # single grid step
    steps = -(-b16 // max_tile)
    if steps % 2:
        steps += 1                            # even step count -> both v7x TCs busy
    tb = _round_up(-(-b16 // steps), 16)
    return tb, tb * steps


@functools.partial(jax.jit, static_argnames=("n_actions", "max_tile"))
def pg_pi_packed(state, w1_p, b1_p, w2_p, b2_p, *, n_actions, max_tile=1024):
    """Pallas implementation of PG.pi given pre-packed params.

    state: (B, state_dim) or (state_dim,) float32; returns (B, n_actions) / (n_actions,).
    """
    squeeze = state.ndim == 1
    x = state[None, :] if squeeze else state
    B, state_dim = x.shape
    h_pad = w1_p.shape[1]
    a_pad = w2_p.shape[1]
    compute_dtype = w1_p.dtype
    itemsize = jnp.dtype(compute_dtype).itemsize

    tb, b_pad = _choose_tiles(B, max_tile)
    # Batch pad + bf16 cast fuse into a single wrapper pass under jit;
    # K stays unpadded (full-last-dim block).
    x = jnp.pad(x.astype(compute_dtype), ((0, b_pad - B), (0, 0)))

    grid = (b_pad // tb,)
    cost = pl.CostEstimate(
        flops=2 * b_pad * (state_dim * h_pad + h_pad * a_pad),
        transcendentals=b_pad * (a_pad + 1),
        bytes_accessed=(b_pad * state_dim * itemsize                 # x
                        + (state_dim * h_pad + h_pad * a_pad) * itemsize  # weights
                        + (h_pad + a_pad) * 4                        # biases
                        + b_pad * n_actions * 4),                    # output
    )

    out = pl.pallas_call(
        functools.partial(_pg_pi_kernel, n_actions=n_actions),
        out_shape=jax.ShapeDtypeStruct((b_pad, n_actions), jnp.float32),
        grid=grid,
        in_specs=[
            pl.BlockSpec((tb, state_dim), lambda i: (i, 0)),   # x: unpadded K
            pl.BlockSpec((state_dim, h_pad), lambda i: (0, 0)),
            pl.BlockSpec((1, h_pad), lambda i: (0, 0)),
            pl.BlockSpec((h_pad, a_pad), lambda i: (0, 0)),
            pl.BlockSpec((1, a_pad), lambda i: (0, 0)),
        ],
        out_specs=pl.BlockSpec((tb, n_actions), lambda i: (i, 0)),
        compiler_params=pltpu.CompilerParams(
            dimension_semantics=("parallel",)),
        cost_estimate=cost,
    )(x, w1_p, b1_p, w2_p, b2_p)

    probs = out[:B]
    return probs[0] if squeeze else probs


def pg_pi(state, w1, b1, w2, b2, **kwargs):
    """Convenience wrapper (packs params each call; prefer pack_pg_params + pg_pi_packed)."""
    return pg_pi_packed(state, *pack_pg_params(w1, b1, w2, b2),
                        n_actions=w2.shape[1], **kwargs)


def _ref_pi_f32(state, w1, b1, w2, b2):
    h = jnp.maximum(state @ w1 + b1, 0.0)
    return jax.nn.softmax(h @ w2 + b2, axis=-1)


def _ref_pi_emulated(state, w1, b1, w2, b2, compute_dtype=jnp.bfloat16):
    # Emulates the kernel's precision path: bf16 matmul operands, f32 accum + bias + epilogue.
    c = lambda a: a.astype(compute_dtype)
    h = jnp.maximum(
        jnp.dot(c(state), c(w1), preferred_element_type=jnp.float32) + b1, 0.0)
    logits = jnp.dot(c(h), c(w2), preferred_element_type=jnp.float32) + b2
    return jax.nn.softmax(logits, axis=-1)


if __name__ == "__main__":
    # Shapes consistent with the module: state_dim=32, hidden_dim=48, n_actions=4.
    B, state_dim, hidden_dim, n_actions = 200, 32, 48, 4

    key = jax.random.PRNGKey(0)
    k_x, k_w1, k_b1, k_w2, k_b2 = jax.random.split(key, 5)

    # PyTorch Linear default init (uniform +-1/sqrt(fan_in)), stored (in, out)
    # so the math is x @ W + b  ==  x @ W_pt.T + b_pt.
    lim1 = 1.0 / jnp.sqrt(jnp.float32(state_dim))
    lim2 = 1.0 / jnp.sqrt(jnp.float32(hidden_dim))
    x = jax.random.normal(k_x, (B, state_dim), dtype=jnp.float32)
    w1 = jax.random.uniform(k_w1, (state_dim, hidden_dim), jnp.float32, -lim1, lim1)
    b1 = jax.random.uniform(k_b1, (hidden_dim,), jnp.float32, -lim1, lim1)
    w2 = jax.random.uniform(k_w2, (hidden_dim, n_actions), jnp.float32, -lim2, lim2)
    b2 = jax.random.uniform(k_b2, (n_actions,), jnp.float32, -lim2, lim2)

    # Pack weights ONCE; reuse for every policy step (batched learn + per-step pi).
    packed = pack_pg_params(w1, b1, w2, b2)

    # Batched `learn()` path: single grid step (tb = round_up(200, 16) = 208).
    probs = pg_pi_packed(x, *packed, n_actions=n_actions)
    jax.block_until_ready(probs)

    assert probs.shape == (B, n_actions)
    assert jnp.allclose(jnp.sum(probs, axis=-1), 1.0, atol=5e-3)

    ref_emul = _ref_pi_emulated(x, w1, b1, w2, b2)
    assert jnp.allclose(probs, ref_emul, atol=2e-3, rtol=2e-3), (
        float(jnp.max(jnp.abs(probs - ref_emul))))

    ref_f32 = _ref_pi_f32(x, w1, b1, w2, b2)
    assert jnp.allclose(probs, ref_f32, atol=3e-2), (
        float(jnp.max(jnp.abs(probs - ref_f32))))

    # Single-state `pi()` path (API parity; batch env states for best throughput).
    p1 = pg_pi_packed(x[0], *packed, n_actions=n_actions)
    jax.block_until_ready(p1)
    assert p1.shape == (n_actions,)
    assert jnp.allclose(jnp.sum(p1), 1.0, atol=5e-3)
    assert jnp.allclose(p1, ref_f32[0], atol=3e-2)

    # TODO(synk): learn()/Adam backward, Categorical sampling and reward discounting are
    # host-side / training logic, not part of the forward pass translated here.
    print("KERNEL_OK")
</pallas_src>

<mosaic_0001>
module attributes {stable_mosaic.version = 11 : i64} {
  func.func @_pg_pi_kernel(%arg0: i32, %arg1: memref<208x32xbf16, #tpu.memory_space<vmem>>, %arg2: memref<32x128xbf16, #tpu.memory_space<vmem>>, %arg3: memref<1x128xf32, #tpu.memory_space<vmem>>, %arg4: memref<128x128xbf16, #tpu.memory_space<vmem>>, %arg5: memref<1x128xf32, #tpu.memory_space<vmem>>, %arg6: memref<208x4xf32, #tpu.memory_space<vmem>>) attributes {dimension_semantics = [#tpu.dimension_semantics<parallel>], iteration_bounds = array<i64: 1>, scalar_prefetch = 0 : i64, scratch_operands = 0 : i64, tpu.core_type = #tpu.core_type<tc>, window_params = [{transform_indices = @transform_0, window_bounds = array<i64: 208, 32>}, {pipeline_mode = #tpu.pipeline_mode<synchronous>, transform_indices = @transform_1, window_bounds = array<i64: 32, 128>}, {pipeline_mode = #tpu.pipeline_mode<synchronous>, transform_indices = @transform_2, window_bounds = array<i64: 1, 128>}, {pipeline_mode = #tpu.pipeline_mode<synchronous>, transform_indices = @transform_3, window_bounds = array<i64: 128, 128>}, {pipeline_mode = #tpu.pipeline_mode<synchronous>, transform_indices = @transform_4, window_bounds = array<i64: 1, 128>}, {transform_indices = @transform_5, window_bounds = array<i64: 208, 4>}]} {
    %c0 = arith.constant 0 : index
    %c0_0 = arith.constant 0 : index
    %0 = vector.load %arg1[%c0, %c0_0] : memref<208x32xbf16, #tpu.memory_space<vmem>>, vector<208x32xbf16>
    %c0_1 = arith.constant 0 : index
    %c0_2 = arith.constant 0 : index
    %1 = vector.load %arg2[%c0_1, %c0_2] : memref<32x128xbf16, #tpu.memory_space<vmem>>, vector<32x128xbf16>
    %cst = arith.constant dense<0.000000e+00> : vector<208x128xf32>
    %2 = tpu.matmul %0, %1, %cst {dimension_numbers = #tpu.dot_dimension_numbers<[1], [0], [0], [1], [0, 0, 1, 1], [], []>} : vector<208x32xbf16>, vector<32x128xbf16>, vector<208x128xf32> -> vector<208x128xf32>
    %c0_3 = arith.constant 0 : index
    %c0_4 = arith.constant 0 : index
    %3 = vector.load %arg3[%c0_3, %c0_4] : memref<1x128xf32, #tpu.memory_space<vmem>>, vector<1x128xf32>
    %4 = vector.broadcast %3 : vector<1x128xf32> to vector<208x128xf32>
    %5 = arith.addf %2, %4 : vector<208x128xf32>
    %cst_5 = arith.constant 0.000000e+00 : f32
    %6 = vector.broadcast %cst_5 : f32 to vector<208x128xf32>
    %7 = arith.maximumf %5, %6 : vector<208x128xf32>
    %8 = arith.truncf %7 : vector<208x128xf32> to vector<208x128xbf16>
    %c0_6 = arith.constant 0 : index
    %c0_7 = arith.constant 0 : index
    %9 = vector.load %arg4[%c0_6, %c0_7] : memref<128x128xbf16, #tpu.memory_space<vmem>>, vector<128x128xbf16>
    %cst_8 = arith.constant dense<0.000000e+00> : vector<208x128xf32>
    %10 = tpu.matmul %8, %9, %cst_8 {dimension_numbers = #tpu.dot_dimension_numbers<[1], [0], [0], [1], [0, 0, 1, 1], [], []>} : vector<208x128xbf16>, vector<128x128xbf16>, vector<208x128xf32> -> vector<208x128xf32>
    %c0_9 = arith.constant 0 : index
    %c0_10 = arith.constant 0 : index
    %11 = vector.load %arg5[%c0_9, %c0_10] : memref<1x128xf32, #tpu.memory_space<vmem>>, vector<1x128xf32>
    %12 = vector.broadcast %11 : vector<1x128xf32> to vector<208x128xf32>
    %13 = arith.addf %10, %12 : vector<208x128xf32>
    %cst_11 = arith.constant dense<0xFF800000> : vector<208xf32>
    %14 = vector.multi_reduction <maximumf>, %13, %cst_11 [1] : vector<208x128xf32> to vector<208xf32>
    %15 = vector.shape_cast %14 : vector<208xf32> to vector<208x1xf32>
    %16 = vector.broadcast %15 : vector<208x1xf32> to vector<208x128xf32>
    %17 = arith.subf %13, %16 : vector<208x128xf32>
    %18 = math.exp %17 : vector<208x128xf32>
    %cst_12 = arith.constant dense<0.000000e+00> : vector<208xf32>
    %19 = vector.multi_reduction <add>, %18, %cst_12 [1] : vector<208x128xf32> to vector<208xf32>
    %20 = vector.shape_cast %19 : vector<208xf32> to vector<208x1xf32>
    %21 = tpu.reciprocal %20 {approx = true} : vector<208x1xf32> -> vector<208x1xf32>
    %22 = vector.broadcast %21 : vector<208x1xf32> to vector<208x128xf32>
    %23 = arith.mulf %18, %22 : vector<208x128xf32>
    %24 = vector.extract_strided_slice %23 {offsets = [0, 0], sizes = [208, 4], strides = [1, 1]} : vector<208x128xf32> to vector<208x4xf32>
    %c0_13 = arith.constant 0 : index
    %c0_14 = arith.constant 0 : index
    %25 = vector.load %arg6[%c0_13, %c0_14] : memref<208x4xf32, #tpu.memory_space<vmem>>, vector<208x4xf32>
    tpu.vector_store %arg6[%c0_13, %c0_14], %24 {strides = array<i32>} : memref<208x4xf32, #tpu.memory_space<vmem>>, vector<208x4xf32>,
    return
  }
  func.func @transform_0(%arg0: i32) -> (i32, i32) {
    %c0_i32 = arith.constant 0 : i32
    %c0_i32_0 = arith.constant 0 : i32
    return %arg0, %c0_i32 : i32, i32
  }
  func.func @transform_1(%arg0: i32) -> (i32, i32) {
    %c0_i32 = arith.constant 0 : i32
    %c0_i32_0 = arith.constant 0 : i32
    %c0_i32_1 = arith.constant 0 : i32
    return %c0_i32, %c0_i32_0 : i32, i32
  }
  func.func @transform_2(%arg0: i32) -> (i32, i32) {
    %c0_i32 = arith.constant 0 : i32
    %c0_i32_0 = arith.constant 0 : i32
    %c0_i32_1 = arith.constant 0 : i32
    return %c0_i32, %c0_i32_0 : i32, i32
  }
  func.func @transform_3(%arg0: i32) -> (i32, i32) {
    %c0_i32 = arith.constant 0 : i32
    %c0_i32_0 = arith.constant 0 : i32
    %c0_i32_1 = arith.constant 0 : i32
    return %c0_i32, %c0_i32_0 : i32, i32
  }
  func.func @transform_4(%arg0: i32) -> (i32, i32) {
    %c0_i32 = arith.constant 0 : i32
    %c0_i32_0 = arith.constant 0 : i32
    %c0_i32_1 = arith.constant 0 : i32
    return %c0_i32, %c0_i32_0 : i32, i32
  }
  func.func @transform_5(%arg0: i32) -> (i32, i32) {
    %c0_i32 = arith.constant 0 : i32
    %c0_i32_0 = arith.constant 0 : i32
    return %arg0, %c0_i32 : i32, i32
  }
}

</mosaic_0001>

<bundles_post_ra>
// kernel: pg_pi_packed.1
= control target key start
LH: loop header
LB: loop body
LE: loop exit
PB: predicated region body
PF: predicated region fallthrough
CT: control target
= control target key end

     0   :  { %vm132_vm0 = vcmask 261120   ;;  %vm661_vm1 = vcmask 31744   ;;  %s1434_s1 = inlined_call_operand.vmem [shape: bf16[32,128], index: 1, kind: input, shape index: {}]   ;;  %s1435_s2 = inlined_call_operand.vmem [shape: f32[1,128], index: 2, kind: input, shape index: {}]   ;;  %s1436_s0 = inlined_call_operand.vmem [shape: bf16[208,32], index: 0, kind: input, shape index: {}]   ;;  %s1437_s3 = inlined_call_operand.vmem [shape: bf16[128,128], index: 3, kind: input, shape index: {}]   ;;  %s1438_s4 = inlined_call_operand.vmem [shape: f32[1,128], index: 4, kind: input, shape index: {}]   ;;  %s1439_s5 = inlined_call_operand.vmem [shape: f32[208,4], index: 5, kind: output, shape index: {}]  }
   0x1   :  { %v811_v0 = vld [vmem:[%s1434_s1 + $0x8] sm:$0xff]  ;;  %v810_v1 = vld [vmem:[%s1434_s1] sm:$0xff]  ;;  %v799_v6 = vld [vmem:[%s1436_s0 + $0x10] sm:$0xff] }
   0x2   :  { %178 = vmatpush.bf16.msra.mxu0 %v811_v0  ;;  %820 = vmatpush.bf16.msra.mxu3 %v811_v0  ;;  %v797_v2 = vld [vmem:[%s1436_s0] sm:$0xff]  ;;  %v798_v4 = vld [vmem:[%s1436_s0 + $0x8] sm:$0xff]  ;;  %v807_v7 = vld [vmem:[%s1436_s0 + $0x50] sm:$0xff] }
   0x3   :  { %v805_v3 = vld [vmem:[%s1436_s0 + $0x40] sm:$0xff]  ;;  %v806_v5 = vld [vmem:[%s1436_s0 + $0x48] sm:$0xff]  ;;  %v800_v8 = vld [vmem:[%s1436_s0 + $0x18] sm:$0xff] }
   0x4   :  { %v808_v9 = vld [vmem:[%s1436_s0 + $0x58] sm:$0xff]  ;;  %v801_v10 = vld [vmem:[%s1436_s0 + $0x20] sm:$0xff]  ;;  %v802_v13 = vld [vmem:[%s1436_s0 + $0x28] sm:$0xff] }
   0x5   :  { %v809_v11 = vld [vmem:[%s1436_s0 + $0x60] sm:$0xff]  ;;  %v819_v12 = vld [vmem:[%s1437_s3 + $0x38] sm:$0xff]  ;;  %v818_v14 = vld [vmem:[%s1437_s3 + $0x30] sm:$0xff] }
   0x6   :  { %179 = vmatpush.bf16.msra.mxu0 %v810_v1  ;;  %821 = vmatpush.bf16.msra.mxu3 %v810_v1  ;;  %v817_v15 = vld [vmem:[%s1437_s3 + $0x28] sm:$0xff]  ;;  %v816_v16 = vld [vmem:[%s1437_s3 + $0x20] sm:$0xff]  ;;  %v815_v17 = vld [vmem:[%s1437_s3 + $0x18] sm:$0xff] }
   0x7   :  { %353 = vmatpush.bf16.msra.mxu1 %v819_v12  ;;  %822 = vmatpush.bf16.msra.mxu2 %v819_v12  ;;  %v803_v18 = vld [vmem:[%s1436_s0 + $0x30] sm:$0xff]  ;;  %v813_v20 = vld [vmem:[%s1437_s3 + $0x8] sm:$0xff]  ;;  %v812_v21 = vld [vmem:[%s1437_s3] sm:$0xff] }
   0x8   :  { %v814_v19 = vld [vmem:[%s1437_s3 + $0x10] sm:$0xff]  ;;  %v804_v22 = vld [vmem:[%s1436_s0 + $0x38] sm:$0xff]  ;;  %v1059_v24 = vld [vmem:[%s1435_s2] ss:$0 sm:$0xff] }
   0x9   :  { %752 = vmatmul.msk.bf16.vlgmr.msra.gmra.mxu0 %vm132_vm0, %v797_v2  ;;  %760 = vmatmul.msk.bf16.vlgmr.msra.gmra.mxu3 %vm132_vm0, %v805_v3 }
   0xa   :  { %823 = vmatpush.bf16.msrb.mxu3 %v819_v12 }
   0xb   :  { %354 = vmatpush.bf16.msra.mxu1 %v818_v14  ;;  %824 = vmatpush.bf16.msra.mxu2 %v818_v14 }
   0xe   :  { %825 = vmatpush.bf16.msrb.mxu3 %v818_v14 }
   0xf   :  { %355 = vmatpush.bf16.msra.mxu1 %v817_v15  ;;  %826 = vmatpush.bf16.msra.mxu2 %v817_v15 }
  0x12   :  { %827 = vmatpush.bf16.msrb.mxu3 %v817_v15 }
  0x13   :  { %356 = vmatpush.bf16.msra.mxu1 %v816_v16  ;;  %828 = vmatpush.bf16.msra.mxu2 %v816_v16 }
  0x16   :  { %829 = vmatpush.bf16.msrb.mxu3 %v816_v16 }
  0x17   :  { %357 = vmatpush.bf16.msra.mxu1 %v815_v17  ;;  %830 = vmatpush.bf16.msra.mxu2 %v815_v17 }
  0x19   :  { %753 = vmatmul.msk.bf16.gmra.mxu0 %vm132_vm0, %v798_v4  ;;  %761 = vmatmul.msk.bf16.gmra.mxu3 %vm132_vm0, %v806_v5 }
  0x1a   :  { %831 = vmatpush.bf16.msrb.mxu3 %v815_v17 }
  0x1b   :  { %358 = vmatpush.bf16.msra.mxu1 %v814_v19  ;;  %832 = vmatpush.bf16.msra.mxu2 %v814_v19 }
  0x1e   :  { %833 = vmatpush.bf16.msrb.mxu3 %v814_v19 }
  0x1f   :  { %359 = vmatpush.bf16.msra.mxu1 %v813_v20  ;;  %834 = vmatpush.bf16.msra.mxu2 %v813_v20 }
  0x22   :  { %835 = vmatpush.bf16.msrb.mxu3 %v813_v20 }
  0x23   :  { %360 = vmatpush.bf16.msra.mxu1 %v812_v21  ;;  %836 = vmatpush.bf16.msra.mxu2 %v812_v21 }
  0x26   :  { %837 = vmatpush.bf16.msrb.mxu3 %v812_v21 }
  0x29   :  { %754 = vmatmul.msk.bf16.gmra.mxu0 %vm132_vm0, %v799_v6  ;;  %762 = vmatmul.msk.bf16.gmra.mxu3 %vm132_vm0, %v807_v7 }
  0x39   :  { %755 = vmatmul.msk.bf16.gmra.mxu0 %vm132_vm0, %v800_v8  ;;  %763 = vmatmul.msk.bf16.gmra.mxu3 %vm132_vm0, %v808_v9 }
  0x49   :  { %756 = vmatmul.msk.bf16.gmra.mxu0 %vm132_vm0, %v801_v10  ;;  %764 = vmatmul.msk.bf16.gmra.mxu3 %vm132_vm0, %v809_v11 }
  0x59   :  { %757 = vmatmul.msk.bf16.gmra.mxu0 %vm132_vm0, %v802_v13 }
  0x69   :  { %758 = vmatmul.msk.bf16.gmra.mxu0 %vm132_vm0, %v803_v18 }
  0x79   :  { %759 = vmatmul.msk.bf16.gmra.mxu0 %vm132_vm0, %v804_v22 }
  0x86   :  { %v181_v23 = vpop.f32.mrf.mxu0 }
  0x87   :  { %v182_v26 = vadd.f32 %v1059_v24, %v181_v23 }
  0x89   :  { %v246_v29 = vmax.f32 %v182_v26, 0.0 }
  0x8c   :  { %v221_v25 = vpop.f32.mrf.mxu3 }
  0x8d   :  { %v222_v40 = vadd.f32 %v1059_v24, %v221_v25 }
  0x8e   :  { %v183_v27 = vpop.f32.mrf.mxu0 }
  0x8f   :  { %v184_v28 = vadd.f32 %v1059_v24, %v183_v27  ;;  %v262_v45 = vmax.f32 %v222_v40, 0.0 }
  0x91   :  { %v247_v30 = vmax.f32 %v184_v28, 0.0 }
  0x93   :  { %v272_v31 = vpack.c.bf16 %v247_v30, %v246_v29 }
  0x94   :  { %v223_v32 = vpop.f32.mrf.mxu3 }
  0x95   :  { %361 = vmatmul.bf16.vlgmr.msra.gmra.mxu1 %v272_v31  ;;  %v224_v41 = vadd.f32 %v1059_v24, %v223_v32 }
  0x96   :  { %v186_v33 = vpop.f32.mrf.mxu0 }
  0x97   :  { %v187_v35 = vadd.f32 %v1059_v24, %v186_v33  ;;  %v263_v46 = vmax.f32 %v224_v41, 0.0 }
  0x99   :  { %v248_v38 = vmax.f32 %v187_v35, 0.0  ;;  %v1067_v47 = vpack.c.bf16 %v263_v46, %v262_v45 }
  0x9c   :  { %v226_v34 = vpop.f32.mrf.mxu3 }
  0x9d   :  { %v227_v54 = vadd.f32 %v1059_v24, %v226_v34 }
  0x9e   :  { %v188_v36 = vpop.f32.mrf.mxu0 }
  0x9f   :  { %v189_v37 = vadd.f32 %v1059_v24, %v188_v36  ;;  %v264_v59 = vmax.f32 %v227_v54, 0.0 }
  0xa1   :  { %v249_v39 = vmax.f32 %v189_v37, 0.0 }
  0xa3   :  { %v273_v42 = vpack.c.bf16 %v249_v39, %v248_v38 }
  0xa4   :  { %v228_v43 = vpop.f32.mrf.mxu3 }
  0xa5   :  { %366 = vmatmul.bf16.gmra.mxu1 %v273_v42  ;;  %v229_v55 = vadd.f32 %v1059_v24, %v228_v43 }
  0xa6   :  { %v191_v44 = vpop.f32.mrf.mxu0 }
  0xa7   :  { %v192_v49 = vadd.f32 %v1059_v24, %v191_v44  ;;  %v265_v60 = vmax.f32 %v229_v55, 0.0 }
  0xa9   :  { %v250_v52 = vmax.f32 %v192_v49, 0.0  ;;  %v1073_v61 = vpack.c.bf16 %v265_v60, %v264_v59 }
  0xac   :  { %v231_v48 = vpop.f32.mrf.mxu3 }
  0xad   :  { %v232_v4 = vadd.f32 %v1059_v24, %v231_v48 }
  0xae   :  { %v193_v50 = vpop.f32.mrf.mxu0 }
  0xaf   :  { %v194_v51 = vadd.f32 %v1059_v24, %v193_v50  ;;  %v266_v9 = vmax.f32 %v232_v4, 0.0 }
  0xb1   :  { %v251_v53 = vmax.f32 %v194_v51, 0.0 }
  0xb3   :  { %v274_v56 = vpack.c.bf16 %v251_v53, %v250_v52  ;;  %v1094_v53 = vld [vmem:[%s1438_s4] ss:$0 sm:$0xff] }
  0xb4   :  { %v233_v57 = vpop.f32.mrf.mxu3 }
  0xb5   :  { %371 = vmatmul.bf16.gmra.mxu1 %v274_v56  ;;  %v234_v5 = vadd.f32 %v1059_v24, %v233_v57 }
  0xb6   :  { %v196_v58 = vpop.f32.mrf.mxu0 }
  0xb7   :  { %v197_v63 = vadd.f32 %v1059_v24, %v196_v58  ;;  %v267_v10 = vmax.f32 %v234_v5, 0.0 }
  0xb9   :  { %v252_v2 = vmax.f32 %v197_v63, 0.0  ;;  %v282_v11 = vpack.c.bf16 %v267_v10, %v266_v9 }
  0xbc   :  { %v236_v62 = vpop.f32.mrf.mxu3 }
  0xbd   :  { %v237_v19 = vadd.f32 %v1059_v24, %v236_v62 }
  0xbe   :  { %v198_v0 = vpop.f32.mrf.mxu0 }
  0xbf   :  { %v199_v1 = vadd.f32 %v1059_v24, %v198_v0  ;;  %v268_v27 = vmax.f32 %v237_v19, 0.0 }
  0xc1   :  { %v253_v3 = vmax.f32 %v199_v1, 0.0 }
  0xc3   :  { %v275_v6 = vpack.c.bf16 %v253_v3, %v252_v2 }
  0xc4   :  { %v238_v7 = vpop.f32.mrf.mxu3 }
  0xc5   :  { %376 = vmatmul.bf16.gmra.mxu1 %v275_v6  ;;  %v239_v20 = vadd.f32 %v1059_v24, %v238_v7 }
  0xc6   :  { %v201_v8 = vpop.f32.mrf.mxu0 }
  0xc7   :  { %v202_v13 = vadd.f32 %v1059_v24, %v201_v8  ;;  %v269_v28 = vmax.f32 %v239_v20, 0.0 }
  0xc9   :  { %v254_v16 = vmax.f32 %v202_v13, 0.0  ;;  %v283_v31 = vpack.c.bf16 %v269_v28, %v268_v27 }
  0xcc   :  { %v241_v12 = vpop.f32.mrf.mxu3 }
  0xcd   :  { %v242_v18 = vadd.f32 %v1059_v24, %v241_v12 }
  0xce   :  { %v203_v14 = vpop.f32.mrf.mxu0 }
  0xcf   :  { %v204_v15 = vadd.f32 %v1059_v24, %v203_v14  ;;  %v270_v23 = vmax.f32 %v242_v18, 0.0 }
  0xd1   :  { %v255_v17 = vmax.f32 %v204_v15, 0.0 }
  0xd3   :  { %v276_v21 = vpack.c.bf16 %v255_v17, %v254_v16 }
  0xd4   :  { %v243_v22 = vpop.f32.mrf.mxu3 }
  0xd5   :  { %381 = vmatmul.bf16.gmra.mxu1 %v276_v21  ;;  %v244_v25 = vadd.f32 %v1059_v24, %v243_v22 }
  0xd6   :  { %v206_v26 = vpop.f32.mrf.mxu0 }
  0xd7   :  { %v271_v29 = vmax.f32 %v244_v25, 0.0  ;;  %v207_v32 = vadd.f32 %v1059_v24, %v206_v26 }
  0xd9   :  { %v284_v30 = vpack.c.bf16 %v271_v29, %v270_v23  ;;  %v256_v35 = vmax.f32 %v207_v32, 0.0 }
  0xdb   :  { %421 = vmatmul.bf16.vlgmr.msrb.gmra.mxu3 %v284_v30 }
  0xde   :  { %v208_v33 = vpop.f32.mrf.mxu0 }
  0xdf   :  { %v209_v34 = vadd.f32 %v1059_v24, %v208_v33 }
  0xe1   :  { %v257_v36 = vmax.f32 %v209_v34, 0.0 }
  0xe3   :  { %v277_v37 = vpack.c.bf16 %v257_v36, %v256_v35 }
  0xe5   :  { %386 = vmatmul.bf16.gmra.mxu1 %v277_v37 }
  0xe6   :  { %v211_v38 = vpop.f32.mrf.mxu0 }
  0xe7   :  { %v212_v39 = vadd.f32 %v1059_v24, %v211_v38 }
  0xe9   :  { %v258_v42 = vmax.f32 %v212_v39, 0.0 }
  0xee   :  { %v213_v40 = vpop.f32.mrf.mxu0 }
  0xef   :  { %v214_v41 = vadd.f32 %v1059_v24, %v213_v40 }
  0xf1   :  { %v259_v43 = vmax.f32 %v214_v41, 0.0 }
  0xf3   :  { %v278_v44 = vpack.c.bf16 %v259_v43, %v258_v42 }
  0xf5   :  { %391 = vmatmul.bf16.vlgmr.msra.gmra.mxu2 %v278_v44 }
  0xf6   :  { %v216_v45 = vpop.f32.mrf.mxu0 }
  0xf7   :  { %v217_v46 = vadd.f32 %v1059_v24, %v216_v45 }
  0xf9   :  { %v260_v50 = vmax.f32 %v217_v46, 0.0 }
  0xfe   :  { %v218_v48 = vpop.f32.mrf.mxu0 }
  0xff   :  { %v219_v49 = vadd.f32 %v1059_v24, %v218_v48 }
 0x101   :  { %v261_v51 = vmax.f32 %v219_v49, 0.0 }
 0x103   :  { %v279_v52 = vpack.c.bf16 %v261_v51, %v260_v50 }
 0x105   :  { %396 = vmatmul.bf16.gmra.mxu2 %v279_v52 }
 0x112   :  { %v362_v54 = vpop.f32.mrf.mxu1 }
 0x113   :  { %v363_v55 = vadd.f32 %v1094_v53, %v362_v54 }
 0x115   :  { %401 = vmatmul.bf16.gmra.mxu2 %v1067_v47  ;;  %427 = vmax.xlane.f32.xlu0 %v363_v55 }
 0x11a   :  { %v364_v56 = vpop.f32.mrf.mxu1 }
 0x11b   :  { %v365_v57 = vadd.f32 %v1094_v53, %v364_v56 }
 0x11d   :  { %429 = vmax.xlane.f32.xlu0 %v365_v57 }
 0x122   :  { %v367_v24 = vpop.f32.mrf.mxu1 }
 0x123   :  { %v1100_v58 = vadd.f32 %v1094_v53, %v367_v24 }
 0x125   :  { %406 = vmatmul.bf16.gmra.mxu2 %v1073_v61  ;;  %431 = vmax.xlane.f32.xlu1 %v1100_v58 }
 0x12a   :  { %v369_v59 = vpop.f32.mrf.mxu1 }
 0x12b   :  { %v1105_v60 = vadd.f32 %v1094_v53, %v369_v59 }
 0x12d   :  { %433 = vmax.xlane.f32.xlu1 %v1105_v60 }
 0x132   :  { %v372_v47 = vpop.f32.mrf.mxu1 }
 0x133   :  { %v1109_v62 = vadd.f32 %v1094_v53, %v372_v47 }
 0x135   :  { %411 = vmatmul.bf16.gmra.mxu2 %v282_v11  ;;  %435 = vmax.xlane.f32.xlu2 %v1109_v62 }
 0x13a   :  { %v374_v63 = vpop.f32.mrf.mxu1 }
 0x13b   :  { %v1113_v0 = vadd.f32 %v1094_v53, %v374_v63 }
 0x13d   :  { %437 = vmax.xlane.f32.xlu2 %v1113_v0 }
 0x142   :  { %v377_v61 = vpop.f32.mrf.mxu1 }
 0x143   :  { %v1117_v1 = vadd.f32 %v1094_v53, %v377_v61 }
 0x145   :  { %416 = vmatmul.bf16.gmra.mxu2 %v283_v31  ;;  %439 = vmax.xlane.f32.xlu0 %v1117_v1 }
 0x14a   :  { %v379_v2 = vpop.f32.mrf.mxu1 }
 0x14b   :  { %v1121_v3 = vadd.f32 %v1094_v53, %v379_v2 }
 0x14d   :  { %441 = vmax.xlane.f32.xlu1 %v1121_v3 }
 0x152   :  { %v382_v4 = vpop.f32.mrf.mxu1 }
 0x153   :  { %v1125_v5 = vadd.f32 %v1094_v53, %v382_v4 }
 0x155   :  { %443 = vmax.xlane.f32.xlu2 %v1125_v5 }
 0x15a   :  { %v384_v6 = vpop.f32.mrf.mxu1 }
 0x15b   :  { %v1129_v7 = vadd.f32 %v1094_v53, %v384_v6 }
 0x15d   :  { %445 = vmax.xlane.f32.xlu0 %v1129_v7 }
 0x15e   :  { %v422_v8 = vpop.f32.mrf.mxu3 }
 0x15f   :  { %v1133_v9 = vadd.f32 %v1094_v53, %v422_v8 }
 0x162   :  { %v387_v10 = vpop.f32.mrf.mxu1 }
 0x163   :  { %v1136_v11 = vadd.f32 %v1094_v53, %v387_v10 }
 0x165   :  { %447 = vmax.xlane.f32.xlu1 %v1136_v11  ;;  %475 = vmax.xlane.f32.xlu0 %v1133_v9 }
 0x166   :  { %v424_v12 = vpop.f32.mrf.mxu3 }
 0x167   :  { %v1141_v13 = vadd.f32 %v1094_v53, %v424_v12 }
 0x16a   :  { %v389_v14 = vpop.f32.mrf.mxu1 }
 0x16b   :  { %v1144_v15 = vadd.f32 %v1094_v53, %v389_v14 }
 0x16d   :  { %449 = vmax.xlane.f32.xlu2 %v1144_v15  ;;  %477 = vmax.xlane.f32.xlu1 %v1141_v13 }
 0x178   :  { %v392_v16 = vpop.f32.mrf.mxu2 }
 0x179   :  { %v1149_v17 = vadd.f32 %v1094_v53, %v392_v16 }
 0x17b   :  { %451 = vmax.xlane.f32.xlu0 %v1149_v17 }
 0x180   :  { %v394_v18 = vpop.f32.mrf.mxu2 }
 0x181   :  { %v1153_v19 = vadd.f32 %v1094_v53, %v394_v18 }
 0x183   :  { %453 = vmax.xlane.f32.xlu1 %v1153_v19 }
 0x188   :  { %v397_v20 = vpop.f32.mrf.mxu2  ;;  %v428_v21 = vpop.xlane.xlu0 %427 }
 0x189   :  { %v1157_v22 = vadd.f32 %v1094_v53, %v397_v20  ;;  %v479_v23 = vsub.f32 %v363_v55, %v428_v21 }
 0x18b   :  { %v505_v25 = vmul.f32 1.442695, %v479_v23  ;;  %455 = vmax.xlane.f32.xlu2 %v1157_v22 }
 0x18d   :  { %840 = vpow2.f32 %v505_v25 }
 0x190   :  { %v399_v26 = vpop.f32.mrf.mxu2  ;;  %v430_v27 = vpop.xlane.xlu0 %429 }
 0x191   :  { %v1161_v28 = vadd.f32 %v1094_v53, %v399_v26  ;;  %v480_v29 = vsub.f32 %v365_v57, %v430_v27 }
 0x193   :  { %v1163_v30 = vpop.eup %840  ;;  %v507_v31 = vmul.f32 1.442695, %v480_v29  ;;  %457 = vmax.xlane.f32.xlu0 %v1161_v28 }
 0x194   :  { %557 = vadd.xlane.f32.xlu2 %v1163_v30 }
 0x195   :  { %842 = vpow2.f32 %v507_v31 }
 0x198   :  { %v402_v32 = vpop.f32.mrf.mxu2  ;;  %v432_v33 = vpop.xlane.xlu1 %431 }
 0x199   :  { %v1168_v34 = vadd.f32 %v1094_v53, %v402_v32  ;;  %v481_v35 = vsub.f32 %v1100_v58, %v432_v33 }
 0x19b   :  { %v1171_v36 = vpop.eup %842  ;;  %v509_v37 = vmul.f32 1.442695, %v481_v35  ;;  %459 = vmax.xlane.f32.xlu1 %v1168_v34 }
 0x19c   :  { %559 = vadd.xlane.f32.xlu0 %v1171_v36 }
 0x19d   :  { %844 = vpow2.f32 %v509_v37 }
 0x1a0   :  { %v404_v38 = vpop.f32.mrf.mxu2  ;;  %v434_v39 = vpop.xlane.xlu1 %433 }
 0x1a1   :  { %v1176_v40 = vadd.f32 %v1094_v53, %v404_v38  ;;  %v482_v41 = vsub.f32 %v1105_v60, %v434_v39 }
 0x1a3   :  { %v1179_v42 = vpop.eup %844  ;;  %v511_v43 = vmul.f32 1.442695, %v482_v41  ;;  %461 = vmax.xlane.f32.xlu2 %v1176_v40 }
 0x1a4   :  { %561 = vadd.xlane.f32.xlu1 %v1179_v42 }
 0x1a5   :  { %846 = vpow2.f32 %v511_v43 }
 0x1a8   :  { %v407_v44 = vpop.f32.mrf.mxu2  ;;  %v436_v45 = vpop.xlane.xlu2 %435 }
 0x1a9   :  { %v1184_v46 = vadd.f32 %v1094_v53, %v407_v44  ;;  %v483_v48 = vsub.f32 %v1109_v62, %v436_v45 }
 0x1ab   :  { %v1187_v49 = vpop.eup %846  ;;  %v513_v50 = vmul.f32 1.442695, %v483_v48  ;;  %463 = vmax.xlane.f32.xlu0 %v1184_v46 }
 0x1ac   :  { %563 = vadd.xlane.f32.xlu2 %v1187_v49 }
 0x1ad   :  { %848 = vpow2.f32 %v513_v50 }
 0x1b0   :  { %v409_v51 = vpop.f32.mrf.mxu2  ;;  %v438_v58 = vpop.xlane.xlu2 %437 }
 0x1b1   :  { %v1192_v52 = vadd.f32 %v1094_v53, %v409_v51  ;;  %v484_v62 = vsub.f32 %v1113_v0, %v438_v58 }
 0x1b3   :  { %v1194_v54 = vpop.eup %848  ;;  %465 = vmax.xlane.f32.xlu1 %v1192_v52  ;;  %v515_v63 = vmul.f32 1.442695, %v484_v62 }
 0x1b4   :  { %565 = vadd.xlane.f32.xlu0 %v1194_v54 }
 0x1b8   :  { %v412_v55 = vpop.f32.mrf.mxu2  ;;  %v440_v61 = vpop.xlane.xlu0 %439 }
 0x1b9   :  { %v1199_v56 = vadd.f32 %v1094_v53, %v412_v55  ;;  %v485_v10 = vsub.f32 %v1117_v1, %v440_v61 }
 0x1bb   :  { %467 = vmax.xlane.f32.xlu2 %v1199_v56  ;;  %v517_v0 = vmul.f32 1.442695, %v485_v10 }
 0x1c0   :  { %v414_v57 = vpop.f32.mrf.mxu2  ;;  %v442_v24 = vpop.xlane.xlu1 %441 }
 0x1c1   :  { %v1203_v59 = vadd.f32 %v1094_v53, %v414_v57  ;;  %v486_v60 = vsub.f32 %v1121_v3, %v442_v24 }
 0x1c3   :  { %v519_v47 = vmul.f32 1.442695, %v486_v60  ;;  %469 = vmax.xlane.f32.xlu0 %v1203_v59 }
 0x1c5   :  { %850 = vpow2.f32 %v519_v47 }
 0x1c6   :  { %852 = vpow2.f32 %v515_v63 }
 0x1c7   :  { %854 = vpow2.f32 %v517_v0 }
 0x1c8   :  { %v417_v2 = vpop.f32.mrf.mxu2  ;;  %v444_v6 = vpop.xlane.xlu2 %443 }
 0x1c9   :  { %v1209_v4 = vadd.f32 %v1094_v53, %v417_v2  ;;  %v487_v3 = vsub.f32 %v1125_v5, %v444_v6 }
 0x1cb   :  { %v1211_v8 = vpop.eup %850  ;;  %471 = vmax.xlane.f32.xlu1 %v1209_v4  ;;  %v521_v12 = vmul.f32 1.442695, %v487_v3 }
 0x1cc   :  { %571 = vadd.xlane.f32.xlu0 %v1211_v8  ;;  %v1220_v20 = vpop.eup %852 }
 0x1cd   :  { %856 = vpow2.f32 %v521_v12  ;;  %v1225_v23 = vpop.eup %854 }
 0x1d0   :  { %v419_v14 = vpop.f32.mrf.mxu2  ;;  %v446_v18 = vpop.xlane.xlu0 %445 }
 0x1d1   :  { %v1218_v16 = vadd.f32 %v1094_v53, %v419_v14  ;;  %v488_v1 = vsub.f32 %v1129_v7, %v446_v18 }
 0x1d3   :  { %567 = vadd.xlane.f32.xlu1 %v1220_v20  ;;  %473 = vmax.xlane.f32.xlu2 %v1218_v16  ;;  %v523_v5 = vmul.f32 1.442695, %v488_v1  ;;  %v1228_v26 = vpop.eup %856 }
 0x1d5   :  { %858 = vpow2.f32 %v523_v5 }
 0x1d8   :  { %v448_v21 = vpop.xlane.xlu1 %447 }
 0x1d9   :  { %v489_v25 = vsub.f32 %v1136_v11, %v448_v21  ;;  %v1239_v11 = vpop.xlane.xlu0 %475 }
 0x1db   :  { %v525_v53 = vmul.f32 1.442695, %v489_v25  ;;  %573 = vadd.xlane.f32.xlu1 %v1228_v26  ;;  %569 = vadd.xlane.f32.xlu2 %v1225_v23  ;;  %v1233_v31 = vpop.eup %858 }
 0x1dd   :  { %860 = vpow2.f32 %v525_v53 }
 0x1e0   :  { %v450_v27 = vpop.xlane.xlu2 %449  ;;  %v1244_v35 = vpop.xlane.xlu1 %477 }
 0x1e1   :  { %v490_v29 = vsub.f32 %v1144_v15, %v450_v27 }
 0x1e3   :  { %v1235_v7 = vpop.eup %860  ;;  %v527_v32 = vmul.f32 1.442695, %v490_v29  ;;  %575 = vadd.xlane.f32.xlu2 %v1233_v31 }
 0x1e4   :  { %577 = vadd.xlane.f32.xlu0 %v1235_v7 }
 0x1e5   :  { %862 = vpow2.f32 %v527_v32 }
 0x1eb   :  { %v1241_v33 = vpop.eup %862 }
 0x1ec   :  { %579 = vadd.xlane.f32.xlu1 %v1241_v33 }
 0x1ee   :  { %v452_v37 = vpop.xlane.xlu0 %451 }
 0x1ef   :  { %v491_v15 = vsub.f32 %v1149_v17, %v452_v37 }
 0x1f1   :  { %v529_v38 = vmul.f32 1.442695, %v491_v15 }
 0x1f3   :  { %864 = vpow2.f32 %v529_v38 }
 0x1f6   :  { %v454_v39 = vpop.xlane.xlu1 %453 }
 0x1f7   :  { %v492_v41 = vsub.f32 %v1153_v19, %v454_v39 }
 0x1f9   :  { %v1248_v43 = vpop.eup %864  ;;  %v531_v44 = vmul.f32 1.442695, %v492_v41 }
 0x1fa   :  { %581 = vadd.xlane.f32.xlu2 %v1248_v43 }
 0x1fb   :  { %866 = vpow2.f32 %v531_v44 }
 0x1fe   :  { %v456_v45 = vpop.xlane.xlu2 %455 }
 0x1ff   :  { %v493_v48 = vsub.f32 %v1157_v22, %v456_v45 }
 0x201   :  { %v1252_v50 = vpop.eup %866  ;;  %v533_v51 = vmul.f32 1.442695, %v493_v48 }
 0x202   :  { %583 = vadd.xlane.f32.xlu0 %v1252_v50 }
 0x203   :  { %868 = vpow2.f32 %v533_v51 }
 0x206   :  { %v458_v17 = vpop.xlane.xlu0 %457 }
 0x207   :  { %v494_v55 = vsub.f32 %v1161_v28, %v458_v17  ;;  %v558_v57 = vpop.xlane.xlu2 %557 }
 0x208   :  { %870 = vrcp.f32 %v558_v57 }
 0x209   :  { %v1256_v19 = vpop.eup %868  ;;  %v535_v24 = vmul.f32 1.442695, %v494_v55 }
 0x20a   :  { %585 = vadd.xlane.f32.xlu1 %v1256_v19 }
 0x20b   :  { %872 = vpow2.f32 %v535_v24 }
 0x20e   :  { %v871_v58 = vpop.eup %870  ;;  %v460_v22 = vpop.xlane.xlu1 %459 }
 0x20f   :  { %v635_v60 = vmul.f32 %v871_v58, %v1163_v30  ;;  %v495_v47 = vsub.f32 %v1168_v34, %v460_v22  ;;  %v560_v62 = vpop.xlane.xlu0 %559 }
 0x210   :  { %874 = vrcp.f32 %v560_v62 }
 0x211   :  { %v1261_v63 = vpop.eup %872  ;;  %662 = vst.msk [vmem:[%s1439_s5] sm:$0xff] %vm661_vm1, %v635_v60  ;;  %v537_v28 = vmul.f32 1.442695, %v495_v47 }
 0x212   :  { %587 = vadd.xlane.f32.xlu2 %v1261_v63 }
 0x213   :  { %876 = vpow2.f32 %v537_v28 }
 0x216   :  { %v875_v61 = vpop.eup %874  ;;  %v462_v2 = vpop.xlane.xlu2 %461 }
 0x217   :  { %v636_v6 = vmul.f32 %v875_v61, %v1171_v36  ;;  %v496_v30 = vsub.f32 %v1176_v40, %v462_v2  ;;  %v562_v34 = vpop.xlane.xlu1 %561 }
 0x218   :  { %878 = vrcp.f32 %v562_v34 }
 0x219   :  { %v1270_v10 = vpop.eup %876  ;;  %663 = vst.msk [vmem:[%s1439_s5 + $0x8] sm:$0xff] %vm661_vm1, %v636_v6  ;;  %v539_v3 = vmul.f32 1.442695, %v496_v30 }
 0x21a   :  { %589 = vadd.xlane.f32.xlu0 %v1270_v10 }
 0x21b   :  { %880 = vpow2.f32 %v539_v3 }
 0x21e   :  { %v879_v0 = vpop.eup %878  ;;  %v464_v12 = vpop.xlane.xlu0 %463 }
 0x21f   :  { %v637_v14 = vmul.f32 %v879_v0, %v1179_v42  ;;  %v497_v36 = vsub.f32 %v1184_v46, %v464_v12  ;;  %v564_v40 = vpop.xlane.xlu2 %563 }
 0x220   :  { %882 = vrcp.f32 %v564_v40 }
 0x221   :  { %v1279_v18 = vpop.eup %880  ;;  %664 = vst.msk [vmem:[%s1439_s5 + $0x10] sm:$0xff] %vm661_vm1, %v637_v14  ;;  %v541_v1 = vmul.f32 1.442695, %v497_v36 }
 0x222   :  { %591 = vadd.xlane.f32.xlu1 %v1279_v18 }
 0x223   :  { %884 = vpow2.f32 %v541_v1 }
 0x226   :  { %v883_v5 = vpop.eup %882  ;;  %v466_v21 = vpop.xlane.xlu1 %465 }
 0x227   :  { %v638_v25 = vmul.f32 %v883_v5, %v1187_v49  ;;  %v498_v42 = vsub.f32 %v1192_v52, %v466_v21  ;;  %v566_v46 = vpop.xlane.xlu0 %565 }
 0x228   :  { %886 = vrcp.f32 %v566_v46 }
 0x229   :  { %v1288_v53 = vpop.eup %884  ;;  %665 = vst.msk [vmem:[%s1439_s5 + $0x18] sm:$0xff] %vm661_vm1, %v638_v25  ;;  %v543_v27 = vmul.f32 1.442695, %v498_v42 }
 0x22a   :  { %593 = vadd.xlane.f32.xlu2 %v1288_v53 }
 0x22b   :  { %888 = vpow2.f32 %v543_v27 }
 0x22e   :  { %v887_v29 = vpop.eup %886  ;;  %v468_v32 = vpop.xlane.xlu2 %467 }
 0x22f   :  { %v639_v37 = vmul.f32 %v887_v29, %v1194_v54  ;;  %v499_v49 = vsub.f32 %v1199_v56, %v468_v32  ;;  %v503_v54 = vsub.f32 %v1133_v9, %v1239_v11 }
 0x231   :  { %v1297_v52 = vpop.eup %888  ;;  %666 = vst.msk [vmem:[%s1439_s5 + $0x20] sm:$0xff] %vm661_vm1, %v639_v37  ;;  %v545_v15 = vmul.f32 1.442695, %v499_v49  ;;  %v553_v56 = vmul.f32 1.442695, %v503_v54 }
 0x232   :  { %595 = vadd.xlane.f32.xlu0 %v1297_v52 }
 0x233   :  { %890 = vpow2.f32 %v545_v15 }
 0x236   :  { %v470_v38 = vpop.xlane.xlu0 %469 }
 0x237   :  { %v500_v39 = vsub.f32 %v1203_v59, %v470_v38  ;;  %v504_v59 = vsub.f32 %v1141_v13, %v1244_v35 }
 0x239   :  { %v1305_v41 = vpop.eup %890  ;;  %v547_v44 = vmul.f32 1.442695, %v500_v39  ;;  %v555_v11 = vmul.f32 1.442695, %v504_v59 }
 0x23a   :  { %597 = vadd.xlane.f32.xlu1 %v1305_v41 }
 0x23b   :  { %892 = vpow2.f32 %v547_v44 }
 0x23e   :  { %v472_v45 = vpop.xlane.xlu1 %471 }
 0x23f   :  { %v501_v48 = vsub.f32 %v1209_v4, %v472_v45  ;;  %v572_v51 = vpop.xlane.xlu0 %571 }
 0x240   :  { %894 = vrcp.f32 %v572_v51 }
 0x241   :  { %v1311_v17 = vpop.eup %892  ;;  %v549_v55 = vmul.f32 1.442695, %v501_v48  ;;  %896 = vpow2.f32 %v553_v56 }
 0x242   :  { %599 = vadd.xlane.f32.xlu2 %v1311_v17 }
 0x243   :  { %898 = vpow2.f32 %v549_v55 }
 0x246   :  { %v895_v9 = vpop.eup %894  ;;  %v568_v57 = vpop.xlane.xlu1 %567 }
 0x247   :  { %v474_v24 = vpop.xlane.xlu2 %473  ;;  %v642_v58 = vmul.f32 %v895_v9, %v1211_v8  ;;  %900 = vrcp.f32 %v568_v57  ;;  %v1318_v22 = vpop.eup %896 }
 0x248   :  { %v502_v4 = vsub.f32 %v1218_v16, %v474_v24  ;;  %902 = vpow2.f32 %v555_v11 }
 0x249   :  { %v1320_v60 = vpop.eup %898  ;;  %669 = vst.msk [vmem:[%s1439_s5 + $0x38] sm:$0xff] %vm661_vm1, %v642_v58 }
 0x24a   :  { %v551_v13 = vmul.f32 1.442695, %v502_v4  ;;  %601 = vadd.xlane.f32.xlu0 %v1320_v60  ;;  %605 = vadd.xlane.f32.xlu2 %v1318_v22 }
 0x24c   :  { %904 = vpow2.f32 %v551_v13 }
 0x24d   :  { %v901_v8 = vpop.eup %900 }
 0x24e   :  { %v640_v35 = vmul.f32 %v901_v8, %v1220_v20  ;;  %v574_v16 = vpop.xlane.xlu1 %573  ;;  %v1329_v62 = vpop.eup %902 }
 0x24f   :  { %v570_v47 = vpop.xlane.xlu2 %569  ;;  %906 = vrcp.f32 %v574_v16 }
 0x250   :  { %667 = vst.msk [vmem:[%s1439_s5 + $0x28] sm:$0xff] %vm661_vm1, %v640_v35  ;;  %908 = vrcp.f32 %v570_v47 }
 0x252   :  { %v1335_v28 = vpop.eup %904  ;;  %607 = vadd.xlane.f32.xlu0 %v1329_v62 }
 0x253   :  { %603 = vadd.xlane.f32.xlu1 %v1335_v28 }
 0x255   :  { %v907_v61 = vpop.eup %906 }
 0x256   :  { %v909_v2 = vpop.eup %908  ;;  %v643_v20 = vmul.f32 %v907_v61, %v1228_v26 }
 0x257   :  { %v576_v6 = vpop.xlane.xlu2 %575  ;;  %v641_v30 = vmul.f32 %v909_v2, %v1225_v23  ;;  %v578_v34 = vpop.xlane.xlu0 %577 }
 0x258   :  { %910 = vrcp.f32 %v576_v6  ;;  %670 = vst.msk [vmem:[%s1439_s5 + $0x40] sm:$0xff] %vm661_vm1, %v643_v20 }
 0x259   :  { %912 = vrcp.f32 %v578_v34  ;;  %668 = vst.msk [vmem:[%s1439_s5 + $0x30] sm:$0xff] %vm661_vm1, %v641_v30 }
 0x25e   :  { %v911_v3 = vpop.eup %910 }
 0x25f   :  { %v913_v0 = vpop.eup %912  ;;  %v644_v26 = vmul.f32 %v911_v3, %v1233_v31  ;;  %v580_v23 = vpop.xlane.xlu1 %579 }
 0x260   :  { %v645_v12 = vmul.f32 %v913_v0, %v1235_v7  ;;  %914 = vrcp.f32 %v580_v23 }
 0x261   :  { %671 = vst.msk [vmem:[%s1439_s5 + $0x48] sm:$0xff] %vm661_vm1, %v644_v26 }
 0x262   :  { %672 = vst.msk [vmem:[%s1439_s5 + $0x50] sm:$0xff] %vm661_vm1, %v645_v12 }
 0x266   :  { %v915_v14 = vpop.eup %914 }
 0x267   :  { %v646_v36 = vmul.f32 %v915_v14, %v1241_v33 }
 0x269   :  { %673 = vst.msk [vmem:[%s1439_s5 + $0x58] sm:$0xff] %vm661_vm1, %v646_v36 }
 0x26d   :  { %v582_v31 = vpop.xlane.xlu2 %581 }
 0x26e   :  { %916 = vrcp.f32 %v582_v31 }
 0x274   :  { %v917_v7 = vpop.eup %916 }
 0x275   :  { %v647_v40 = vmul.f32 %v917_v7, %v1248_v43  ;;  %v584_v1 = vpop.xlane.xlu0 %583 }
 0x276   :  { %918 = vrcp.f32 %v584_v1 }
 0x277   :  { %674 = vst.msk [vmem:[%s1439_s5 + $0x60] sm:$0xff] %vm661_vm1, %v647_v40 }
 0x27c   :  { %v919_v5 = vpop.eup %918 }
 0x27d   :  { %v648_v33 = vmul.f32 %v919_v5, %v1252_v50  ;;  %v586_v21 = vpop.xlane.xlu1 %585 }
 0x27e   :  { %920 = vrcp.f32 %v586_v21 }
 0x27f   :  { %675 = vst.msk [vmem:[%s1439_s5 + $0x68] sm:$0xff] %vm661_vm1, %v648_v33 }
 0x284   :  { %v921_v25 = vpop.eup %920 }
 0x285   :  { %v649_v43 = vmul.f32 %v921_v25, %v1256_v19  ;;  %v588_v42 = vpop.xlane.xlu2 %587 }
 0x286   :  { %922 = vrcp.f32 %v588_v42 }
 0x287   :  { %676 = vst.msk [vmem:[%s1439_s5 + $0x70] sm:$0xff] %vm661_vm1, %v649_v43 }
 0x28c   :  { %v923_v46 = vpop.eup %922 }
 0x28d   :  { %v650_v50 = vmul.f32 %v923_v46, %v1261_v63  ;;  %v590_v27 = vpop.xlane.xlu0 %589 }
 0x28e   :  { %924 = vrcp.f32 %v590_v27 }
 0x28f   :  { %677 = vst.msk [vmem:[%s1439_s5 + $0x78] sm:$0xff] %vm661_vm1, %v650_v50 }
 0x294   :  { %v925_v29 = vpop.eup %924 }
 0x295   :  { %v651_v19 = vmul.f32 %v925_v29, %v1270_v10  ;;  %v592_v32 = vpop.xlane.xlu1 %591 }
 0x296   :  { %926 = vrcp.f32 %v592_v32 }
 0x297   :  { %678 = vst.msk [vmem:[%s1439_s5 + $0x80] sm:$0xff] %vm661_vm1, %v651_v19 }
 0x29c   :  { %v927_v37 = vpop.eup %926 }
 0x29d   :  { %v652_v63 = vmul.f32 %v927_v37, %v1279_v18  ;;  %v594_v49 = vpop.xlane.xlu2 %593 }
 0x29e   :  { %928 = vrcp.f32 %v594_v49 }
 0x29f   :  { %679 = vst.msk [vmem:[%s1439_s5 + $0x88] sm:$0xff] %vm661_vm1, %v652_v63 }
 0x2a4   :  { %v929_v15 = vpop.eup %928 }
 0x2a5   :  { %v653_v10 = vmul.f32 %v929_v15, %v1288_v53  ;;  %v596_v38 = vpop.xlane.xlu0 %595 }
 0x2a6   :  { %930 = vrcp.f32 %v596_v38 }
 0x2a7   :  { %680 = vst.msk [vmem:[%s1439_s5 + $0x90] sm:$0xff] %vm661_vm1, %v653_v10 }
 0x2ac   :  { %v931_v39 = vpop.eup %930 }
 0x2ad   :  { %v654_v18 = vmul.f32 %v931_v39, %v1297_v52  ;;  %v598_v44 = vpop.xlane.xlu1 %597 }
 0x2ae   :  { %932 = vrcp.f32 %v598_v44 }
 0x2af   :  { %681 = vst.msk [vmem:[%s1439_s5 + $0x98] sm:$0xff] %vm661_vm1, %v654_v18 }
 0x2b4   :  { %v933_v54 = vpop.eup %932 }
 0x2b5   :  { %v655_v53 = vmul.f32 %v933_v54, %v1305_v41  ;;  %v600_v56 = vpop.xlane.xlu2 %599 }
 0x2b6   :  { %934 = vrcp.f32 %v600_v56 }
 0x2b7   :  { %682 = vst.msk [vmem:[%s1439_s5 + $0xa0] sm:$0xff] %vm661_vm1, %v655_v53 }
 0x2bc   :  { %v935_v45 = vpop.eup %934 }
 0x2bd   :  { %v656_v52 = vmul.f32 %v935_v45, %v1311_v17  ;;  %v606_v48 = vpop.xlane.xlu2 %605  ;;  %v602_v51 = vpop.xlane.xlu0 %601 }
 0x2be   :  { %936 = vrcp.f32 %v606_v48 }
 0x2bf   :  { %683 = vst.msk [vmem:[%s1439_s5 + $0xa8] sm:$0xff] %vm661_vm1, %v656_v52  ;;  %938 = vrcp.f32 %v602_v51 }
 0x2c4   :  { %v937_v41 = vpop.eup %936 }
 0x2c5   :  { %v939_v55 = vpop.eup %938  ;;  %v659_v59 = vmul.f32 %v937_v41, %v1318_v22  ;;  %v608_v11 = vpop.xlane.xlu0 %607 }
 0x2c6   :  { %v604_v9 = vpop.xlane.xlu1 %603  ;;  %v657_v57 = vmul.f32 %v939_v55, %v1320_v60 }
 0x2c7   :  { %940 = vrcp.f32 %v604_v9  ;;  %686 = vst.msk [vmem:[%s1439_s5 + $0xc0] sm:$0xff] %vm661_vm1, %v659_v59 }
 0x2c8   :  { %942 = vrcp.f32 %v608_v11  ;;  %684 = vst.msk [vmem:[%s1439_s5 + $0xb0] sm:$0xff] %vm661_vm1, %v657_v57 }
 0x2cd   :  { %v941_v17 = vpop.eup %940 }
 0x2ce   :  { %v943_v24 = vpop.eup %942  ;;  %v658_v58 = vmul.f32 %v941_v17, %v1335_v28 }
 0x2cf   :  { %v660_v4 = vmul.f32 %v943_v24, %v1329_v62 }
 0x2d0   :  { %685 = vst.msk [vmem:[%s1439_s5 + $0xb8] sm:$0xff] %vm661_vm1, %v658_v58 }
 0x2d1   :  { %687 = vst.msk [vmem:[%s1439_s5 + $0xc8] sm:$0xff] %vm661_vm1, %v660_v4 }

</bundles_post_ra>
